<compile_context>
chip_gen: v5e
topology: v5e:2x2
jax: 0.10.0
libtpu: 0.0.40
codegen_flags: <defaults>
</compile_context>

<pallas_src>
import functools

import jax
import jax.numpy as jnp
from jax.experimental import pallas as pl
from jax.experimental.pallas import tpu as pltpu

C_IN = 7
C_MID = 66
C_OUT = 57


def _silu(v):
    # v * sigmoid(v) == 0.5 * v * (1 + tanh(v/2)); tanh is a single EUP op,
    # the extra muls/adds ride the (slack) VPU slots.
    return 0.5 * v * (1.0 + jnp.tanh(0.5 * v))


def _fused_kernel(x_ref, w1_ref, b1_ref, w2_ref, b2_ref, o_ref, *, nb):
    # x_ref : (NB, C_IN,  TM)   pixel columns on the lane axis
    # w1_ref: (C_MID, C_IN)     b1_ref: (C_MID, 1)
    # w2_ref: (C_OUT, C_MID)    b2_ref: (C_OUT, 1)
    # o_ref : (NB, C_OUT, TM)
    w1 = w1_ref[...]
    b1 = b1_ref[...]
    w2 = w2_ref[...]
    b2 = b2_ref[...]
    # nb is a small static int -> unrolled; keeps every matmul a plain 2-D dot
    # (no batched-dot transpose on the output layout).
    for n in range(nb):
        x = x_ref[n]                                                  # (C_IN, TM)
        v1 = jnp.dot(w1, x, preferred_element_type=jnp.float32) + b1  # (C_MID, TM)
        v3 = _silu(v1)
        v4 = jnp.dot(w2, v3, preferred_element_type=jnp.float32) + b2  # (C_OUT, TM)
        o_ref[n] = _silu(v4).astype(o_ref.dtype)


def _choose_tile(num_pixels, max_tile=4096):
    """Pick the lane-axis pixel tile (multiple of 128), as large as practical.

    Prefer an exact divisor of num_pixels (no padding copy / no wasted writes);
    if the only exact divisors are tiny, prefer a large padded tile instead
    (long contiguous HBM rows beat avoiding a small amount of padding).
    """
    if num_pixels <= max_tile:
        tm = pl.cdiv(num_pixels, 128) * 128
        return tm, tm
    best_div = 0
    for t in range(128, max_tile + 1, 128):
        if num_pixels % t == 0:
            best_div = t
    if best_div >= 1024:
        return best_div, num_pixels
    tm = max_tile
    return tm, pl.cdiv(num_pixels, tm) * tm


def _choose_nb(batch, tile_m, target_pixels=2048):
    """Pack several images per grid step when the pixel tile is small.

    Amortizes the ~0.35 us per-step overhead and turns many tiny strided output
    DMAs into fewer larger ones.  NB must divide the batch.
    """
    nb = 1
    for cand in range(1, batch + 1):
        if batch % cand == 0 and cand * tile_m <= target_pixels:
            nb = cand
    return nb


@jax.jit
def model_forward(x_nchw, w1t, b1, w2t, b2):
    """x_nchw: (N, 7, H, W) f32.  w1t: (66, 7), b1: (66, 1), w2t: (57, 66), b2: (57, 1).

    Returns (N, 57, H, W) f32.
    """
    N, C, H, W = x_nchw.shape
    assert C == C_IN
    P = H * W

    # NCHW is already channels x pixels per image: metadata-only reshape.
    x3 = x_nchw.reshape(N, C_IN, P)

    tile_m, padded_p = _choose_tile(P)
    if padded_p != P:
        # Only taken when H*W is not a multiple of 128.
        x3 = jnp.pad(x3, ((0, 0), (0, 0), (0, padded_p - P)))

    nb = _choose_nb(N, tile_m)
    grid = (N // nb, padded_p // tile_m)

    # VMEM budget: double-buffered in/out blocks + f32 intermediates
    # (sublanes padded 7->8, 57->64, 66->72), with 2x headroom; clamped so the
    # request is safe on all generations (v7x has only 64 MiB physical / TC).
    blk_bytes = 4 * nb * tile_m * (2 * 8 + 2 * 64 + 4 * 72)
    vmem_limit = int(min(max(2 * blk_bytes + (1 << 20), 16 << 20), 32 << 20))

    kernel = functools.partial(_fused_kernel, nb=nb)

    out3 = pl.pallas_call(
        kernel,
        out_shape=jax.ShapeDtypeStruct((N, C_OUT, padded_p), jnp.float32),
        grid=grid,
        in_specs=[
            # pixel tiles: (NB, C_IN, TM)
            pl.BlockSpec((nb, C_IN, tile_m), lambda n, i: (n, 0, i)),
            # weights/biases: constant block index -> resident in VMEM
            pl.BlockSpec((C_MID, C_IN), lambda n, i: (0, 0)),
            pl.BlockSpec((C_MID, 1), lambda n, i: (0, 0)),
            pl.BlockSpec((C_OUT, C_MID), lambda n, i: (0, 0)),
            pl.BlockSpec((C_OUT, 1), lambda n, i: (0, 0)),
        ],
        out_specs=pl.BlockSpec((nb, C_OUT, tile_m), lambda n, i: (n, 0, i)),
        compiler_params=pltpu.CompilerParams(
            dimension_semantics=("parallel", "parallel"),
            vmem_limit_bytes=vmem_limit,
        ),
    )(x3, w1t, b1, w2t, b2)

    if padded_p != P:
        out3 = out3[:, :, :P]
    return out3.reshape(N, C_OUT, H, W)


def _init_params(key):
    # PyTorch ConvTranspose2d(7, 66, 1) weight is (in=7, out=66, 1, 1); we keep the
    # transposed (out, in) matrices so the kernel needs no in-kernel transpose.
    k1, k2, k3, k4 = jax.random.split(key, 4)
    bound1 = 1.0 / (C_IN ** 0.5)
    bound2 = 1.0 / (C_MID ** 0.5)
    w1t = jax.random.uniform(k1, (C_MID, C_IN), jnp.float32, -bound1, bound1)
    b1 = jax.random.uniform(k2, (C_MID, 1), jnp.float32, -bound1, bound1)
    w2t = jax.random.uniform(k3, (C_OUT, C_MID), jnp.float32, -bound2, bound2)
    b2 = jax.random.uniform(k4, (C_OUT, 1), jnp.float32, -bound2, bound2)
    return w1t, b1, w2t, b2


if __name__ == "__main__":
    key = jax.random.PRNGKey(0)
    kx, kp = jax.random.split(key)

    # Small shapes consistent with the module: batch=2, C_in=7, spatial 16x16.
    N, H, W = 2, 16, 16
    x = jax.random.normal(kx, (N, C_IN, H, W), jnp.float32)
    w1t, b1, w2t, b2 = _init_params(kp)

    out = model_forward(x, w1t, b1, w2t, b2)
    out = jax.block_until_ready(out)

    # Pure-JAX reference of the fused 1x1-convtranspose + SiLU chain.
    xr = x.reshape(N, C_IN, H * W)
    v1 = jnp.einsum("oc,ncp->nop", w1t, xr) + b1
    v3 = v1 * jax.nn.sigmoid(v1)
    v4 = jnp.einsum("oc,ncp->nop", w2t, v3) + b2
    v6 = v4 * jax.nn.sigmoid(v4)
    ref = v6.reshape(N, C_OUT, H, W)

    assert out.shape == (N, C_OUT, H, W)
    assert jnp.allclose(out, ref, atol=1e-4, rtol=1e-4)

    print("KERNEL_OK")
</pallas_src>

<mosaic_0001>
module attributes {stable_mosaic.version = 11 : i64} {
  func.func @_fused_kernel(%arg0: i32, %arg1: i32, %arg2: memref<2x7x256xf32, #tpu.memory_space<vmem>>, %arg3: memref<66x7xf32, #tpu.memory_space<vmem>>, %arg4: memref<66x1xf32, #tpu.memory_space<vmem>>, %arg5: memref<57x66xf32, #tpu.memory_space<vmem>>, %arg6: memref<57x1xf32, #tpu.memory_space<vmem>>, %arg7: memref<2x57x256xf32, #tpu.memory_space<vmem>>) attributes {dimension_semantics = [#tpu.dimension_semantics<parallel>, #tpu.dimension_semantics<parallel>], iteration_bounds = array<i64: 1, 1>, scalar_prefetch = 0 : i64, scratch_operands = 0 : i64, tpu.core_type = #tpu.core_type<tc>, window_params = [{transform_indices = @transform_0, window_bounds = array<i64: 2, 7, 256>}, {pipeline_mode = #tpu.pipeline_mode<synchronous>, transform_indices = @transform_1, window_bounds = array<i64: 66, 7>}, {pipeline_mode = #tpu.pipeline_mode<synchronous>, transform_indices = @transform_2, window_bounds = array<i64: 66, 1>}, {pipeline_mode = #tpu.pipeline_mode<synchronous>, transform_indices = @transform_3, window_bounds = array<i64: 57, 66>}, {pipeline_mode = #tpu.pipeline_mode<synchronous>, transform_indices = @transform_4, window_bounds = array<i64: 57, 1>}, {transform_indices = @transform_5, window_bounds = array<i64: 2, 57, 256>}]} {
    %c0 = arith.constant 0 : index
    %c0_0 = arith.constant 0 : index
    %0 = vector.load %arg3[%c0, %c0_0] : memref<66x7xf32, #tpu.memory_space<vmem>>, vector<66x7xf32>
    %c0_1 = arith.constant 0 : index
    %c0_2 = arith.constant 0 : index
    %1 = vector.load %arg4[%c0_1, %c0_2] : memref<66x1xf32, #tpu.memory_space<vmem>>, vector<66x1xf32>
    %c0_3 = arith.constant 0 : index
    %c0_4 = arith.constant 0 : index
    %2 = vector.load %arg5[%c0_3, %c0_4] : memref<57x66xf32, #tpu.memory_space<vmem>>, vector<57x66xf32>
    %c0_5 = arith.constant 0 : index
    %c0_6 = arith.constant 0 : index
    %3 = vector.load %arg6[%c0_5, %c0_6] : memref<57x1xf32, #tpu.memory_space<vmem>>, vector<57x1xf32>
    %c0_7 = arith.constant 0 : index
    %c0_8 = arith.constant 0 : index
    %c0_9 = arith.constant 0 : index
    %4 = vector.load %arg2[%c0_7, %c0_8, %c0_9] : memref<2x7x256xf32, #tpu.memory_space<vmem>>, vector<1x7x256xf32>
    %5 = vector.shape_cast %4 : vector<1x7x256xf32> to vector<7x256xf32>
    %cst = arith.constant dense<0.000000e+00> : vector<66x256xf32>
    %6 = tpu.matmul %0, %5, %cst {dimension_numbers = #tpu.dot_dimension_numbers<[1], [0], [0], [1], [0, 0, 1, 1], [], []>} : vector<66x7xf32>, vector<7x256xf32>, vector<66x256xf32> -> vector<66x256xf32>
    %7 = vector.broadcast %1 : vector<66x1xf32> to vector<66x256xf32>
    %8 = arith.addf %6, %7 : vector<66x256xf32>
    %cst_10 = arith.constant 5.000000e-01 : f32
    %9 = vector.broadcast %cst_10 : f32 to vector<66x256xf32>
    %10 = arith.mulf %9, %8 : vector<66x256xf32>
    %cst_11 = arith.constant 5.000000e-01 : f32
    %11 = vector.broadcast %cst_11 : f32 to vector<66x256xf32>
    %12 = arith.mulf %11, %8 : vector<66x256xf32>
    %13 = math.tanh %12 : vector<66x256xf32>
    %cst_12 = arith.constant 1.000000e+00 : f32
    %14 = vector.broadcast %cst_12 : f32 to vector<66x256xf32>
    %15 = arith.addf %14, %13 : vector<66x256xf32>
    %16 = arith.mulf %10, %15 : vector<66x256xf32>
    %cst_13 = arith.constant dense<0.000000e+00> : vector<57x256xf32>
    %17 = tpu.matmul %2, %16, %cst_13 {dimension_numbers = #tpu.dot_dimension_numbers<[1], [0], [0], [1], [0, 0, 1, 1], [], []>} : vector<57x66xf32>, vector<66x256xf32>, vector<57x256xf32> -> vector<57x256xf32>
    %18 = vector.broadcast %3 : vector<57x1xf32> to vector<57x256xf32>
    %19 = arith.addf %17, %18 : vector<57x256xf32>
    %cst_14 = arith.constant 5.000000e-01 : f32
    %20 = vector.broadcast %cst_14 : f32 to vector<57x256xf32>
    %21 = arith.mulf %20, %19 : vector<57x256xf32>
    %cst_15 = arith.constant 5.000000e-01 : f32
    %22 = vector.broadcast %cst_15 : f32 to vector<57x256xf32>
    %23 = arith.mulf %22, %19 : vector<57x256xf32>
    %24 = math.tanh %23 : vector<57x256xf32>
    %cst_16 = arith.constant 1.000000e+00 : f32
    %25 = vector.broadcast %cst_16 : f32 to vector<57x256xf32>
    %26 = arith.addf %25, %24 : vector<57x256xf32>
    %27 = arith.mulf %21, %26 : vector<57x256xf32>
    %c0_17 = arith.constant 0 : index
    %c0_18 = arith.constant 0 : index
    %c0_19 = arith.constant 0 : index
    %28 = vector.load %arg7[%c0_17, %c0_18, %c0_19] : memref<2x57x256xf32, #tpu.memory_space<vmem>>, vector<1x57x256xf32>
    %29 = vector.shape_cast %28 : vector<1x57x256xf32> to vector<57x256xf32>
    %30 = vector.shape_cast %27 : vector<57x256xf32> to vector<1x57x256xf32>
    tpu.vector_store %arg7[%c0_17, %c0_18, %c0_19], %30 {strides = array<i32>} : memref<2x57x256xf32, #tpu.memory_space<vmem>>, vector<1x57x256xf32>,
    %c1 = arith.constant 1 : index
    %c0_20 = arith.constant 0 : index
    %c0_21 = arith.constant 0 : index
    %31 = vector.load %arg2[%c1, %c0_20, %c0_21] : memref<2x7x256xf32, #tpu.memory_space<vmem>>, vector<1x7x256xf32>
    %32 = vector.shape_cast %31 : vector<1x7x256xf32> to vector<7x256xf32>
    %cst_22 = arith.constant dense<0.000000e+00> : vector<66x256xf32>
    %33 = tpu.matmul %0, %32, %cst_22 {dimension_numbers = #tpu.dot_dimension_numbers<[1], [0], [0], [1], [0, 0, 1, 1], [], []>} : vector<66x7xf32>, vector<7x256xf32>, vector<66x256xf32> -> vector<66x256xf32>
    %34 = vector.broadcast %1 : vector<66x1xf32> to vector<66x256xf32>
    %35 = arith.addf %33, %34 : vector<66x256xf32>
    %cst_23 = arith.constant 5.000000e-01 : f32
    %36 = vector.broadcast %cst_23 : f32 to vector<66x256xf32>
    %37 = arith.mulf %36, %35 : vector<66x256xf32>
    %cst_24 = arith.constant 5.000000e-01 : f32
    %38 = vector.broadcast %cst_24 : f32 to vector<66x256xf32>
    %39 = arith.mulf %38, %35 : vector<66x256xf32>
    %40 = math.tanh %39 : vector<66x256xf32>
    %cst_25 = arith.constant 1.000000e+00 : f32
    %41 = vector.broadcast %cst_25 : f32 to vector<66x256xf32>
    %42 = arith.addf %41, %40 : vector<66x256xf32>
    %43 = arith.mulf %37, %42 : vector<66x256xf32>
    %cst_26 = arith.constant dense<0.000000e+00> : vector<57x256xf32>
    %44 = tpu.matmul %2, %43, %cst_26 {dimension_numbers = #tpu.dot_dimension_numbers<[1], [0], [0], [1], [0, 0, 1, 1], [], []>} : vector<57x66xf32>, vector<66x256xf32>, vector<57x256xf32> -> vector<57x256xf32>
    %45 = vector.broadcast %3 : vector<57x1xf32> to vector<57x256xf32>
    %46 = arith.addf %44, %45 : vector<57x256xf32>
    %cst_27 = arith.constant 5.000000e-01 : f32
    %47 = vector.broadcast %cst_27 : f32 to vector<57x256xf32>
    %48 = arith.mulf %47, %46 : vector<57x256xf32>
    %cst_28 = arith.constant 5.000000e-01 : f32
    %49 = vector.broadcast %cst_28 : f32 to vector<57x256xf32>
    %50 = arith.mulf %49, %46 : vector<57x256xf32>
    %51 = math.tanh %50 : vector<57x256xf32>
    %cst_29 = arith.constant 1.000000e+00 : f32
    %52 = vector.broadcast %cst_29 : f32 to vector<57x256xf32>
    %53 = arith.addf %52, %51 : vector<57x256xf32>
    %54 = arith.mulf %48, %53 : vector<57x256xf32>
    %c1_30 = arith.constant 1 : index
    %c0_31 = arith.constant 0 : index
    %c0_32 = arith.constant 0 : index
    %55 = vector.load %arg7[%c1_30, %c0_31, %c0_32] : memref<2x57x256xf32, #tpu.memory_space<vmem>>, vector<1x57x256xf32>
    %56 = vector.shape_cast %55 : vector<1x57x256xf32> to vector<57x256xf32>
    %57 = vector.shape_cast %54 : vector<57x256xf32> to vector<1x57x256xf32>
    tpu.vector_store %arg7[%c1_30, %c0_31, %c0_32], %57 {strides = array<i32>} : memref<2x57x256xf32, #tpu.memory_space<vmem>>, vector<1x57x256xf32>,
    return
  }
  func.func @transform_0(%arg0: i32, %arg1: i32) -> (i32, i32, i32) {
    %c0_i32 = arith.constant 0 : i32
    %c0_i32_0 = arith.constant 0 : i32
    return %arg0, %c0_i32, %arg1 : i32, i32, i32
  }
  func.func @transform_1(%arg0: i32, %arg1: i32) -> (i32, i32) {
    %c0_i32 = arith.constant 0 : i32
    %c0_i32_0 = arith.constant 0 : i32
    %c0_i32_1 = arith.constant 0 : i32
    return %c0_i32, %c0_i32_0 : i32, i32
  }
  func.func @transform_2(%arg0: i32, %arg1: i32) -> (i32, i32) {
    %c0_i32 = arith.constant 0 : i32
    %c0_i32_0 = arith.constant 0 : i32
    %c0_i32_1 = arith.constant 0 : i32
    return %c0_i32, %c0_i32_0 : i32, i32
  }
  func.func @transform_3(%arg0: i32, %arg1: i32) -> (i32, i32) {
    %c0_i32 = arith.constant 0 : i32
    %c0_i32_0 = arith.constant 0 : i32
    %c0_i32_1 = arith.constant 0 : i32
    return %c0_i32, %c0_i32_0 : i32, i32
  }
  func.func @transform_4(%arg0: i32, %arg1: i32) -> (i32, i32) {
    %c0_i32 = arith.constant 0 : i32
    %c0_i32_0 = arith.constant 0 : i32
    %c0_i32_1 = arith.constant 0 : i32
    return %c0_i32, %c0_i32_0 : i32, i32
  }
  func.func @transform_5(%arg0: i32, %arg1: i32) -> (i32, i32, i32) {
    %c0_i32 = arith.constant 0 : i32
    %c0_i32_0 = arith.constant 0 : i32
    return %arg0, %c0_i32, %arg1 : i32, i32, i32
  }
}

</mosaic_0001>

<bundles_post_ra>
// kernel: model_forward.1
= control target key start
LH: loop header
LB: loop body
LE: loop exit
PB: predicated region body
PF: predicated region fallthrough
CT: control target
= control target key end

     0   :  { %vm129_vm0 = vcmask 1046528   ;;  %vm101_vm1 = vcmask 56320   ;;  %v1106_v3 = vmov 0   ;;  %vm361_vm2 = vcmask 1041408   ;;  %s1728_s0 = inlined_call_operand.vmem [shape: f32[2,7,256], index: 0, kind: input, shape index: {}]   ;;  %s1729_s1 = inlined_call_operand.vmem [shape: f32[66,7], index: 1, kind: input, shape index: {}]   ;;  %s1730_s2 = inlined_call_operand.vmem [shape: f32[66,1], index: 2, kind: input, shape index: {}]   ;;  %s1731_s4 = inlined_call_operand.vmem [shape: f32[57,1], index: 4, kind: input, shape index: {}]   ;;  %s1732_s3 = inlined_call_operand.vmem [shape: f32[57,66], index: 3, kind: input, shape index: {}]   ;;  %s1733_s5 = inlined_call_operand.vmem [shape: f32[2,57,256], index: 5, kind: output, shape index: {}]  }
   0x1   :  { %v54_v0 = vld [vmem:[%s1728_s0] sm:$0x7f]  ;;  %v55_v1 = vld [vmem:[%s1728_s0 + $0x8] sm:$0x7f]  ;;  %968 = vset.pattern.permute.xlu1 %v1106_v3  ;;  %967 = vset.pattern.permute.xlu0 %v1106_v3  ;;  %v35_v4 = vld [vmem:[%s1730_s2 + $0x30] sm:$0xff]  ;;  %vm336_vm3 = vcmask 539648  }
   0x2   :  { %v1146_v2 = vld [vmem:[%s1729_s1] sm:$0xff]  ;;  %872 = vmatpush.msk.msra.mxu0 %vm129_vm0, %v54_v0  ;;  %882 = vmatpush.msk.msra.mxu1 %vm129_vm0, %v55_v1  ;;  %v21_v7 = vld [vmem:[%s1729_s1 + $0x8] sm:$0xff]  ;;  %v36_v9 = vld [vmem:[%s1730_s2 + $0x38] sm:$0xff] }
   0x3   :  { %v37_v5 = vld [vmem:[%s1730_s2 + $0x40] sm:$0x3]  ;;  %873 = vmatmul.msk.f32.vlgmr.msra.gmra.mxu0 %vm101_vm1, %v1146_v2  ;;  %883 = vmatmul.msk.f32.vlgmr.msra.gmra.mxu1 %vm101_vm1, %v1146_v2  ;;  %v34_v8 = vld [vmem:[%s1730_s2 + $0x28] sm:$0xff]  ;;  %v32_v10 = vld [vmem:[%s1730_s2 + $0x18] sm:$0xff] }
   0x4   :  { %88 = vperm.xlu1 %968, %v35_v4   ;;  %98 = vperm.xlu0 %967, %v37_v5   ;;  %v33_v6 = vld [vmem:[%s1730_s2 + $0x20] sm:$0xff]  ;;  %v910_v11 = vld [vmem:[%s1728_s0 + $0x10] sm:$0x7f]  ;;  %v911_v12 = vld [vmem:[%s1728_s0 + $0x18] sm:$0x7f] }
   0x5   :  { %969 = vset.pattern.permute.xlu2 %v1106_v3  ;;  %912 = vmatpush.msk.msrb.mxu0 %vm129_vm0, %v910_v11  ;;  %v22_v13 = vld [vmem:[%s1729_s1 + $0x10] sm:$0xff]  ;;  %v30_v14 = vld [vmem:[%s1730_s2 + $0x8] sm:$0xff]  ;;  %v29_v16 = vld [vmem:[%s1730_s2] sm:$0xff] }
   0x6   :  { %78 = vperm.xlu2 %969, %v33_v6   ;;  %922 = vmatpush.msk.msrb.mxu1 %vm129_vm0, %v911_v12  ;;  %v31_v15 = vld [vmem:[%s1730_s2 + $0x10] sm:$0xff]  ;;  %v23_v17 = vld [vmem:[%s1729_s1 + $0x18] sm:$0xff]  ;;  %v46_v18 = vld [vmem:[%s1731_s4] sm:$0xff] }
   0x7   :  { %v24_v19 = vld [vmem:[%s1729_s1 + $0x20] sm:$0xff]  ;;  %v47_v20 = vld [vmem:[%s1731_s4 + $0x8] sm:$0xff]  ;;  %v49_v21 = vld [vmem:[%s1731_s4 + $0x18] sm:$0xff] }
   0x8   :  { %v25_v22 = vld [vmem:[%s1729_s1 + $0x28] sm:$0xff]  ;;  %v50_v23 = vld [vmem:[%s1731_s4 + $0x20] sm:$0xff]  ;;  %v52_v24 = vld [vmem:[%s1731_s4 + $0x30] sm:$0xff] }
   0x9   :  { %v26_v25 = vld [vmem:[%s1729_s1 + $0x30] sm:$0xff]  ;;  %v53_v26 = vld [vmem:[%s1731_s4 + $0x38] sm:$0x1]  ;;  %v28_v28 = vld [vmem:[%s1729_s1 + $0x40] sm:$0x3] }
   0xa   :  { %v27_v27 = vld [vmem:[%s1729_s1 + $0x38] sm:$0xff]  ;;  %v48_v29 = vld [vmem:[%s1731_s4 + $0x10] sm:$0xff]  ;;  %v51_v30 = vld [vmem:[%s1731_s4 + $0x28] sm:$0xff] }
   0xb   :  { %874 = vmatmul.msk.f32.gmra.mxu0 %vm101_vm1, %v21_v7  ;;  %884 = vmatmul.msk.f32.gmra.mxu1 %vm101_vm1, %v21_v7 }
   0xc   :  { %83 = vperm.xlu1 %968, %v34_v8   ;;  %93 = vperm.xlu0 %967, %v36_v9  }
   0xe   :  { %73 = vperm.xlu2 %969, %v32_v10  }
  0x13   :  { %875 = vmatmul.msk.f32.gmra.mxu0 %vm101_vm1, %v22_v13  ;;  %885 = vmatmul.msk.f32.gmra.mxu1 %vm101_vm1, %v22_v13 }
  0x14   :  { %63 = vperm.xlu1 %968, %v30_v14   ;;  %68 = vperm.xlu0 %967, %v31_v15  }
  0x16   :  { %58 = vperm.xlu2 %969, %v29_v16  }
  0x1b   :  { %876 = vmatmul.msk.f32.gmra.mxu0 %vm101_vm1, %v23_v17  ;;  %886 = vmatmul.msk.f32.gmra.mxu1 %vm101_vm1, %v23_v17 }
  0x1c   :  { %298 = vperm.xlu0 %967, %v46_v18   ;;  %303 = vperm.xlu1 %968, %v47_v20  }
  0x1e   :  { %308 = vperm.xlu2 %969, %v48_v29  }
  0x23   :  { %877 = vmatmul.msk.f32.gmra.mxu0 %vm101_vm1, %v24_v19  ;;  %887 = vmatmul.msk.f32.gmra.mxu1 %vm101_vm1, %v24_v19 }
  0x24   :  { %313 = vperm.xlu0 %967, %v49_v21   ;;  %318 = vperm.xlu1 %968, %v50_v23  }
  0x26   :  { %323 = vperm.xlu2 %969, %v51_v30  }
  0x2b   :  { %878 = vmatmul.msk.f32.gmra.mxu0 %vm101_vm1, %v25_v22  ;;  %888 = vmatmul.msk.f32.gmra.mxu1 %vm101_vm1, %v25_v22 }
  0x2c   :  { %328 = vperm.xlu0 %967, %v52_v24   ;;  %333 = vperm.xlu1 %968, %v53_v26  }
  0x33   :  { %879 = vmatmul.msk.f32.gmra.mxu0 %vm101_vm1, %v26_v25  ;;  %889 = vmatmul.msk.f32.gmra.mxu1 %vm101_vm1, %v26_v25 }
  0x3b   :  { %880 = vmatmul.msk.f32.gmra.mxu0 %vm101_vm1, %v27_v27  ;;  %890 = vmatmul.msk.f32.gmra.mxu1 %vm101_vm1, %v27_v27 }
  0x43   :  { %881 = vmatmul.msk.f32.gmra.mxu0 %vm101_vm1, %v28_v28  ;;  %891 = vmatmul.msk.f32.gmra.mxu1 %vm101_vm1, %v28_v28 }
  0x4b   :  { %913 = vmatmul.msk.f32.vlgmr.msrb.gmra.mxu0 %vm101_vm1, %v1146_v2  ;;  %923 = vmatmul.msk.f32.vlgmr.msrb.gmra.mxu1 %vm101_vm1, %v1146_v2 }
  0x53   :  { %914 = vmatmul.msk.f32.gmra.mxu0 %vm101_vm1, %v21_v7  ;;  %924 = vmatmul.msk.f32.gmra.mxu1 %vm101_vm1, %v21_v7 }
  0x5b   :  { %915 = vmatmul.msk.f32.gmra.mxu0 %vm101_vm1, %v22_v13  ;;  %925 = vmatmul.msk.f32.gmra.mxu1 %vm101_vm1, %v22_v13 }
  0x60   :  { %v1277_v44 = vpop.permute.xlu2 %78 }
  0x63   :  { %916 = vmatmul.msk.f32.gmra.mxu0 %vm101_vm1, %v23_v17  ;;  %926 = vmatmul.msk.f32.gmra.mxu1 %vm101_vm1, %v23_v17 }
  0x68   :  { %v1284_v52 = vpop.permute.xlu2 %73 }
  0x6b   :  { %917 = vmatmul.msk.f32.gmra.mxu0 %vm101_vm1, %v24_v19  ;;  %927 = vmatmul.msk.f32.gmra.mxu1 %vm101_vm1, %v24_v19 }
  0x70   :  { %v1313_v10 = vpop.permute.xlu2 %58 }
  0x73   :  { %918 = vmatmul.msk.f32.gmra.mxu0 %vm101_vm1, %v25_v22  ;;  %928 = vmatmul.msk.f32.gmra.mxu1 %vm101_vm1, %v25_v22 }
  0x76   :  { %v1275_v43 = vpop.permute.xlu0 %98  ;;  %v1279_v45 = vpop.permute.xlu1 %88 }
  0x7b   :  { %919 = vmatmul.msk.f32.gmra.mxu0 %vm101_vm1, %v26_v25  ;;  %929 = vmatmul.msk.f32.gmra.mxu1 %vm101_vm1, %v26_v25 }
  0x7e   :  { %v1281_v48 = vpop.permute.xlu0 %93  ;;  %v1286_v53 = vpop.permute.xlu1 %83 }
  0x80   :  { %v153_v31 = vpop.f32.mrf.mxu0  ;;  %v1269_v32 = vpop.f32.mrf.mxu1 }
  0x81   :  { %v154_v19 = vadd.f32 %v153_v31, %v1313_v10  ;;  %v198_v30 = vadd.f32 %v1269_v32, %v1313_v10 }
  0x83   :  { %920 = vmatmul.msk.f32.gmra.mxu0 %vm101_vm1, %v27_v27  ;;  %930 = vmatmul.msk.f32.gmra.mxu1 %vm101_vm1, %v27_v27 }
  0x86   :  { %v1305_v4 = vpop.permute.xlu0 %68  ;;  %v1315_v11 = vpop.permute.xlu1 %63 }
  0x88   :  { %v156_v33 = vpop.f32.mrf.mxu0  ;;  %v200_v34 = vpop.f32.mrf.mxu1 }
  0x89   :  { %v157_v20 = vadd.f32 %v156_v33, %v1315_v11  ;;  %v201_v23 = vadd.f32 %v200_v34, %v1315_v11  ;;  %v1348_v34 = vmul.f32 0.5, %v154_v19 }
  0x8b   :  { %921 = vmatmul.msk.f32.gmra.mxu0 %vm101_vm1, %v28_v28  ;;  %931 = vmatmul.msk.f32.gmra.mxu1 %vm101_vm1, %v28_v28 }
  0x90   :  { %v159_v35 = vpop.f32.mrf.mxu0  ;;  %v203_v36 = vpop.f32.mrf.mxu1 }
  0x91   :  { %v160_v14 = vadd.f32 %v159_v35, %v1305_v4  ;;  %v204_v16 = vadd.f32 %v203_v36, %v1305_v4  ;;  %v1350_v35 = vmul.f32 0.5, %v157_v20 }
  0x93   :  { %v1340_v28 = vmul.f32 0.5, %v160_v14  ;;  %v1345_v31 = vmul.f32 0.5, %v204_v16 }
  0x98   :  { %v162_v37 = vpop.f32.mrf.mxu0  ;;  %v206_v38 = vpop.f32.mrf.mxu1 }
  0x99   :  { %v163_v5 = vadd.f32 %v162_v37, %v1284_v52  ;;  %v207_v12 = vadd.f32 %v206_v38, %v1284_v52  ;;  %v1353_v37 = vmul.f32 0.5, %v201_v23 }
  0x9b   :  { %v1329_v21 = vmul.f32 0.5, %v163_v5  ;;  %v1333_v24 = vmul.f32 0.5, %v207_v12 }
  0xa0   :  { %v165_v39 = vpop.f32.mrf.mxu0  ;;  %v209_v40 = vpop.f32.mrf.mxu1 }
  0xa1   :  { %v166_v1 = vadd.f32 %v165_v39, %v1277_v44  ;;  %v210_v6 = vadd.f32 %v209_v40, %v1277_v44 }
  0xa3   :  { %v1322_v15 = vmul.f32 0.5, %v166_v1  ;;  %v1325_v17 = vmul.f32 0.5, %v210_v6 }
  0xa8   :  { %v168_v41 = vpop.f32.mrf.mxu0  ;;  %v212_v42 = vpop.f32.mrf.mxu1 }
  0xa9   :  { %v169_v59 = vadd.f32 %v168_v41, %v1286_v53  ;;  %v213_v61 = vadd.f32 %v212_v42, %v1286_v53 }
  0xab   :  { %v1310_v7 = vmul.f32 0.5, %v169_v59  ;;  %v1318_v13 = vmul.f32 0.5, %v213_v61 }
  0xb0   :  { %v171_v46 = vpop.f32.mrf.mxu0  ;;  %v215_v47 = vpop.f32.mrf.mxu1 }
  0xb1   :  { %v172_v51 = vadd.f32 %v171_v46, %v1279_v45  ;;  %v216_v54 = vadd.f32 %v215_v47, %v1279_v45  ;;  %v1357_v46 = vmul.f32 0.5, %v198_v30 }
  0xb3   :  { %v1291_v57 = vmul.f32 0.5, %v172_v51  ;;  %v1293_v58 = vmul.f32 0.5, %v216_v54 }
  0xb5   :  { %970 = vtanh.f32 %v1291_v57 }
  0xb6   :  { %972 = vtanh.f32 %v1293_v58 }
  0xb8   :  { %v174_v49 = vpop.f32.mrf.mxu0  ;;  %v218_v50 = vpop.f32.mrf.mxu1 }
  0xb9   :  { %v175_v55 = vadd.f32 %v174_v49, %v1281_v48  ;;  %v219_v56 = vadd.f32 %v218_v50, %v1281_v48 }
  0xbb   :  { %v1296_v60 = vmul.f32 0.5, %v175_v55  ;;  %v1299_v62 = vmul.f32 0.5, %v219_v56  ;;  %v971_v18 = vpop.eup %970 }
  0xbc   :  { %v973_v22 = vpop.eup %972  ;;  %v272_v49 = vadd.f32 1.0, %v971_v18 }
  0xbd   :  { %974 = vtanh.f32 %v1296_v60  ;;  %v273_v54 = vadd.f32 1.0, %v973_v22 }
  0xbe   :  { %976 = vtanh.f32 %v1299_v62  ;;  %v290_v5 = vmul.f32 %v272_v49, %v1291_v57 }
  0xc0   :  { %v177_v63 = vpop.f32.mrf.mxu0  ;;  %v221_v0 = vpop.f32.mrf.mxu1 }
  0xc1   :  { %v178_v2 = vadd.f32 %v177_v63, %v1275_v43  ;;  %v222_v3 = vadd.f32 %v221_v0, %v1275_v43 }
  0xc3   :  { %v240_v8 = vmul.f32 0.5, %v178_v2  ;;  %v241_v9 = vmul.f32 0.5, %v222_v3  ;;  %v975_v27 = vpop.eup %974 }
  0xc4   :  { %v977_v29 = vpop.eup %976  ;;  %v274_v39 = vadd.f32 1.0, %v975_v27 }
  0xc5   :  { %978 = vtanh.f32 %v240_v8  ;;  %v275_v41 = vadd.f32 1.0, %v977_v29 }
  0xc6   :  { %980 = vtanh.f32 %v241_v9  ;;  %v292_v61 = vmul.f32 %v274_v39, %v1296_v60  ;;  %v291_v60 = vmul.f32 %v273_v54, %v1293_v58 }
  0xc7   :  { %982 = vtanh.f32 %v1310_v7  ;;  %v293_v1 = vmul.f32 %v275_v41, %v1299_v62 }
  0xc8   :  { %984 = vtanh.f32 %v1318_v13  ;;  %v1336_v25 = vpop.f32.mrf.mxu0  ;;  %v1338_v26 = vpop.f32.mrf.mxu1 }
  0xc9   :  { %986 = vtanh.f32 %v1322_v15 }
  0xca   :  { %988 = vtanh.f32 %v1325_v17 }
  0xcb   :  { %v979_v33 = vpop.eup %978  ;;  %990 = vtanh.f32 %v1329_v21 }
  0xcc   :  { %v981_v36 = vpop.eup %980  ;;  %992 = vtanh.f32 %v1333_v24  ;;  %v276_v38 = vadd.f32 1.0, %v979_v33 }
  0xcd   :  { %v983_v40 = vpop.eup %982  ;;  %994 = vtanh.f32 %v1340_v28  ;;  %v277_v32 = vadd.f32 1.0, %v981_v36 }
  0xce   :  { %v985_v42 = vpop.eup %984  ;;  %996 = vtanh.f32 %v1345_v31  ;;  %v294_v47 = vmul.f32 %v276_v38, %v240_v8  ;;  %v270_v63 = vadd.f32 1.0, %v983_v40 }
  0xcf   :  { %v987_v50 = vpop.eup %986  ;;  %998 = vtanh.f32 %v1350_v35  ;;  %v295_v51 = vmul.f32 %v277_v32, %v241_v9  ;;  %v271_v2 = vadd.f32 1.0, %v985_v42 }
  0xd0   :  { %v989_v55 = vpop.eup %988  ;;  %1000 = vtanh.f32 %v1353_v37  ;;  %892 = vmatpush.msk.msra.mxu2 %vm361_vm2, %v294_v47  ;;  %v1363_v56 = vpop.f32.mrf.mxu0  ;;  %v268_v6 = vadd.f32 1.0, %v987_v50  ;;  %v288_v14 = vmul.f32 %v270_v63, %v1310_v7  ;;  %v1420_v50 = vld [vmem:[%s1732_s3 + $0x18] sm:$0xff] }
  0xd1   :  { %v1365_v59 = vpop.f32.mrf.mxu1  ;;  %v991_v0 = vpop.eup %990  ;;  %1002 = vtanh.f32 %v1348_v34  ;;  %901 = vmatpush.msk.msra.mxu3 %vm361_vm2, %v295_v51  ;;  %v269_v9 = vadd.f32 1.0, %v989_v55  ;;  %v289_v62 = vmul.f32 %v271_v2, %v1318_v13  ;;  %v1429_v55 = vld [vmem:[%s1732_s3 + $0x20] sm:$0xff] }
  0xd2   :  { %v993_v3 = vpop.eup %992  ;;  %1004 = vtanh.f32 %v1357_v46  ;;  %376 = vmatpush.msra.mxu2 %v292_v61  ;;  %v266_v16 = vadd.f32 1.0, %v991_v0  ;;  %v286_v57 = vmul.f32 %v268_v6, %v1322_v15 }
  0xd3   :  { %v995_v8 = vpop.eup %994  ;;  %417 = vmatpush.msra.mxu3 %v293_v1  ;;  %v267_v19 = vadd.f32 1.0, %v993_v3  ;;  %v287_v58 = vmul.f32 %v269_v9, %v1325_v17 }
  0xd4   :  { %v997_v12 = vpop.eup %996  ;;  %377 = vmatpush.msra.mxu2 %v290_v5  ;;  %v264_v22 = vadd.f32 1.0, %v995_v8  ;;  %v284_v33 = vmul.f32 %v266_v16, %v1329_v21  ;;  %v1446_v8 = vld [vmem:[%s1732_s3 + $0x28] sm:$0xff] }
  0xd5   :  { %v999_v18 = vpop.eup %998  ;;  %418 = vmatpush.msra.mxu3 %v291_v60  ;;  %v265_v27 = vadd.f32 1.0, %v997_v12  ;;  %v285_v36 = vmul.f32 %v267_v19, %v1333_v24  ;;  %v1392_v24 = vld [vmem:[%s1732_s3] sm:$0xff] }
  0xd6   :  { %v1001_v20 = vpop.eup %1000  ;;  %378 = vmatpush.msra.mxu2 %v288_v14  ;;  %v262_v13 = vadd.f32 1.0, %v999_v18  ;;  %v282_v15 = vmul.f32 %v264_v22, %v1340_v28 }
  0xd7   :  { %v1003_v23 = vpop.eup %1002  ;;  %419 = vmatpush.msra.mxu3 %v289_v62  ;;  %v263_v38 = vadd.f32 1.0, %v1001_v20  ;;  %v283_v17 = vmul.f32 %v265_v27, %v1345_v31 }
  0xd8   :  { %v1005_v29 = vpop.eup %1004  ;;  %379 = vmatpush.msra.mxu2 %v286_v57  ;;  %v1378_v30 = vpop.f32.mrf.mxu0  ;;  %v260_v39 = vadd.f32 1.0, %v1003_v23  ;;  %v280_v32 = vmul.f32 %v262_v13, %v1350_v35  ;;  %v560_v13 = vadd.f32 %v1363_v56, %v1315_v11 }
  0xd9   :  { %v1380_v7 = vpop.f32.mrf.mxu1  ;;  %420 = vmatpush.msra.mxu3 %v287_v58  ;;  %v261_v40 = vadd.f32 1.0, %v1005_v29  ;;  %v281_v41 = vmul.f32 %v263_v38, %v1353_v37 }
  0xda   :  { %380 = vmatpush.msra.mxu2 %v284_v33  ;;  %v278_v21 = vmul.f32 %v260_v39, %v1348_v34  ;;  %v1402_v34 = vld [vmem:[%s1732_s3 + $0x8] sm:$0xff]  ;;  %v607_v27 = vadd.f32 %v1380_v7, %v1305_v4 }
  0xdb   :  { %421 = vmatpush.msra.mxu3 %v285_v36  ;;  %v279_v28 = vmul.f32 %v261_v40, %v1357_v46  ;;  %v1411_v46 = vld [vmem:[%s1732_s3 + $0x10] sm:$0xff] }
  0xdc   :  { %381 = vmatpush.msra.mxu2 %v282_v15  ;;  %v557_v15 = vadd.f32 %v1336_v25, %v1313_v10  ;;  %v1509_v25 = vmul.f32 0.5, %v560_v13 }
  0xdd   :  { %422 = vmatpush.msra.mxu3 %v283_v17  ;;  %v601_v17 = vadd.f32 %v1338_v26, %v1313_v10 }
  0xde   :  { %382 = vmatpush.msra.mxu2 %v280_v32  ;;  %v1515_v26 = vmul.f32 0.5, %v557_v15 }
  0xdf   :  { %423 = vmatpush.msra.mxu3 %v281_v41 }
  0xe0   :  { %383 = vmatpush.msra.mxu2 %v278_v21  ;;  %v565_v31 = vpop.f32.mrf.mxu0 }
  0xe1   :  { %v609_v42 = vpop.f32.mrf.mxu1  ;;  %424 = vmatpush.msra.mxu3 %v279_v28  ;;  %893 = vmatmul.msk.f32.vlgmr.msra.gmra.mxu2 %vm336_vm3, %v1392_v24  ;;  %v566_v19 = vadd.f32 %v565_v31, %v1284_v52 }
  0xe2   :  { %902 = vmatmul.msk.f32.vlgmr.msra.gmra.mxu3 %vm336_vm3, %v1392_v24 }
  0xe3   :  { %v1487_v36 = vmul.f32 0.5, %v566_v19 }
  0xe8   :  { %v568_v35 = vpop.f32.mrf.mxu0 }
  0xe9   :  { %v612_v37 = vpop.f32.mrf.mxu1  ;;  %894 = vmatmul.msk.f32.gmra.mxu2 %vm336_vm3, %v1402_v34 }
  0xea   :  { %903 = vmatmul.msk.f32.gmra.mxu3 %vm336_vm3, %v1402_v34  ;;  %v613_v20 = vadd.f32 %v612_v37, %v1277_v44 }
  0xec   :  { %v1478_v29 = vmul.f32 0.5, %v613_v20 }
  0xf0   :  { %v571_v47 = vpop.f32.mrf.mxu0 }
  0xf1   :  { %v615_v49 = vpop.f32.mrf.mxu1  ;;  %895 = vmatmul.msk.f32.gmra.mxu2 %vm336_vm3, %v1411_v46  ;;  %v572_v60 = vadd.f32 %v571_v47, %v1286_v53  ;;  %v1524_v47 = vld [vmem:[%s1732_s3 + $0x38] sm:$0x1] }
  0xf2   :  { %904 = vmatmul.msk.f32.gmra.mxu3 %vm336_vm3, %v1411_v46 }
  0xf8   :  { %v574_v51 = vpop.f32.mrf.mxu0 }
  0xf9   :  { %v618_v54 = vpop.f32.mrf.mxu1  ;;  %896 = vmatmul.msk.f32.gmra.mxu2 %vm336_vm3, %v1420_v50  ;;  %v575_v0 = vadd.f32 %v574_v51, %v1279_v45 }
  0xfa   :  { %905 = vmatmul.msk.f32.gmra.mxu3 %vm336_vm3, %v1420_v50  ;;  %v619_v1 = vadd.f32 %v618_v54, %v1279_v45  ;;  %v616_v45 = vadd.f32 %v615_v49, %v1286_v53  ;;  %v1465_v53 = vmul.f32 0.5, %v572_v60 }
  0xfb   :  { %v1439_v5 = vmul.f32 0.5, %v575_v0 }
  0xfc   :  { %v1441_v6 = vmul.f32 0.5, %v619_v1  ;;  %v1469_v23 = vmul.f32 0.5, %v616_v45 }
  0xfd   :  { %1006 = vtanh.f32 %v1439_v5 }
  0xfe   :  { %1008 = vtanh.f32 %v1441_v6 }
 0x100   :  { %v577_v61 = vpop.f32.mrf.mxu0 }
 0x101   :  { %v621_v63 = vpop.f32.mrf.mxu1  ;;  %897 = vmatmul.msk.f32.gmra.mxu2 %vm336_vm3, %v1429_v55  ;;  %v578_v2 = vadd.f32 %v577_v61, %v1281_v48 }
 0x102   :  { %906 = vmatmul.msk.f32.gmra.mxu3 %vm336_vm3, %v1429_v55  ;;  %v622_v3 = vadd.f32 %v621_v63, %v1281_v48  ;;  %v569_v48 = vadd.f32 %v568_v35, %v1277_v44  ;;  %v563_v44 = vadd.f32 %v1378_v30, %v1305_v4  ;;  %v604_v4 = vadd.f32 %v1365_v59, %v1315_v11 }
 0x103   :  { %v1449_v9 = vmul.f32 0.5, %v578_v2  ;;  %v1007_v33 = vpop.eup %1006  ;;  %v1504_v11 = vmul.f32 0.5, %v607_v27  ;;  %v1518_v35 = vmul.f32 0.5, %v601_v17 }
 0x104   :  { %v1452_v12 = vmul.f32 0.5, %v622_v3  ;;  %v1474_v58 = vmul.f32 0.5, %v569_v48  ;;  %v1009_v30 = vpop.eup %1008  ;;  %v1497_v39 = vmul.f32 0.5, %v563_v44  ;;  %v1512_v32 = vmul.f32 0.5, %v604_v4 }
 0x105   :  { %1010 = vtanh.f32 %v1449_v9  ;;  %v675_v49 = vadd.f32 1.0, %v1007_v33  ;;  %v676_v61 = vadd.f32 1.0, %v1009_v30 }
 0x106   :  { %1012 = vtanh.f32 %v1452_v12 }
 0x107   :  { %v694_v48 = vmul.f32 %v676_v61, %v1441_v6 }
 0x108   :  { %v580_v14 = vpop.f32.mrf.mxu0 }
 0x109   :  { %v624_v16 = vpop.f32.mrf.mxu1  ;;  %v581_v18 = vadd.f32 %v580_v14, %v1275_v43  ;;  %898 = vmatmul.msk.f32.gmra.mxu2 %vm336_vm3, %v1446_v8 }
 0x10a   :  { %v625_v62 = vadd.f32 %v624_v16, %v1275_v43  ;;  %907 = vmatmul.msk.f32.gmra.mxu3 %vm336_vm3, %v1446_v8  ;;  %v610_v43 = vadd.f32 %v609_v42, %v1284_v52  ;;  %v1483_v52 = vld [vmem:[%s1732_s3 + $0x30] sm:$0xff] }
 0x10b   :  { %v643_v57 = vmul.f32 0.5, %v581_v18  ;;  %v1011_v38 = vpop.eup %1010 }
 0x10c   :  { %v644_v22 = vmul.f32 0.5, %v625_v62  ;;  %v1492_v7 = vmul.f32 0.5, %v610_v43  ;;  %v1013_v56 = vpop.eup %1012  ;;  %v677_v21 = vadd.f32 1.0, %v1011_v38 }
 0x10d   :  { %1014 = vtanh.f32 %v643_v57  ;;  %v678_v31 = vadd.f32 1.0, %v1013_v56 }
 0x10e   :  { %1016 = vtanh.f32 %v644_v22  ;;  %v695_v0 = vmul.f32 %v677_v21, %v1449_v9  ;;  %v693_v9 = vmul.f32 %v675_v49, %v1439_v5 }
 0x10f   :  { %1018 = vtanh.f32 %v1465_v53  ;;  %v696_v3 = vmul.f32 %v678_v31, %v1452_v12 }
 0x110   :  { %1020 = vtanh.f32 %v1469_v23 }
 0x111   :  { %1022 = vtanh.f32 %v1474_v58  ;;  %899 = vmatmul.msk.f32.gmra.mxu2 %vm336_vm3, %v1483_v52 }
 0x112   :  { %1024 = vtanh.f32 %v1478_v29  ;;  %908 = vmatmul.msk.f32.gmra.mxu3 %vm336_vm3, %v1483_v52 }
 0x113   :  { %v1015_v59 = vpop.eup %1014  ;;  %1026 = vtanh.f32 %v1487_v36 }
 0x114   :  { %v1017_v40 = vpop.eup %1016  ;;  %1028 = vtanh.f32 %v1492_v7  ;;  %v679_v41 = vadd.f32 1.0, %v1015_v59 }
 0x115   :  { %v1019_v10 = vpop.eup %1018  ;;  %1030 = vtanh.f32 %v1497_v39  ;;  %v680_v28 = vadd.f32 1.0, %v1017_v40 }
 0x116   :  { %v1021_v42 = vpop.eup %1020  ;;  %1032 = vtanh.f32 %v1504_v11  ;;  %v697_v37 = vmul.f32 %v679_v41, %v643_v57  ;;  %v673_v1 = vadd.f32 1.0, %v1019_v10 }
 0x117   :  { %v1023_v51 = vpop.eup %1022  ;;  %1034 = vtanh.f32 %v1509_v25  ;;  %v698_v54 = vmul.f32 %v680_v28, %v644_v22  ;;  %v674_v60 = vadd.f32 1.0, %v1021_v42 }
 0x118   :  { %v1025_v63 = vpop.eup %1024  ;;  %1036 = vtanh.f32 %v1512_v32  ;;  %932 = vmatpush.msk.msrb.mxu2 %vm361_vm2, %v697_v37  ;;  %v671_v14 = vadd.f32 1.0, %v1023_v51  ;;  %v691_v12 = vmul.f32 %v673_v1, %v1465_v53 }
 0x119   :  { %v1027_v2 = vpop.eup %1026  ;;  %1038 = vtanh.f32 %v1515_v26  ;;  %941 = vmatpush.msk.msrb.mxu3 %vm361_vm2, %v698_v54  ;;  %900 = vmatmul.msk.f32.gmra.mxu2 %vm336_vm3, %v1524_v47  ;;  %v672_v18 = vadd.f32 1.0, %v1025_v63  ;;  %v692_v57 = vmul.f32 %v674_v60, %v1469_v23 }
 0x11a   :  { %v1029_v45 = vpop.eup %1028  ;;  %1040 = vtanh.f32 %v1518_v35  ;;  %909 = vmatmul.msk.f32.gmra.mxu3 %vm336_vm3, %v1524_v47  ;;  %713 = vmatpush.msrb.mxu2 %v695_v0  ;;  %v669_v19 = vadd.f32 1.0, %v1027_v2  ;;  %v689_v5 = vmul.f32 %v671_v14, %v1474_v58 }
 0x11b   :  { %v1031_v16 = vpop.eup %1030  ;;  %754 = vmatpush.msrb.mxu3 %v696_v3  ;;  %v670_v22 = vadd.f32 1.0, %v1029_v45  ;;  %v690_v6 = vmul.f32 %v672_v18, %v1478_v29 }
 0x11c   :  { %v1033_v62 = vpop.eup %1032  ;;  %714 = vmatpush.msrb.mxu2 %v693_v9  ;;  %v667_v44 = vadd.f32 1.0, %v1031_v16  ;;  %v687_v53 = vmul.f32 %v669_v19, %v1487_v36 }
 0x11d   :  { %v1035_v20 = vpop.eup %1034  ;;  %755 = vmatpush.msrb.mxu3 %v694_v48  ;;  %v668_v33 = vadd.f32 1.0, %v1033_v62  ;;  %v688_v4 = vmul.f32 %v670_v22, %v1492_v7 }
 0x11e   :  { %v1037_v43 = vpop.eup %1036  ;;  %715 = vmatpush.msrb.mxu2 %v691_v12  ;;  %v665_v30 = vadd.f32 1.0, %v1035_v20  ;;  %v685_v38 = vmul.f32 %v667_v44, %v1497_v39 }
 0x11f   :  { %v1039_v27 = vpop.eup %1038  ;;  %756 = vmatpush.msrb.mxu3 %v692_v57  ;;  %v666_v23 = vadd.f32 1.0, %v1037_v43  ;;  %v686_v58 = vmul.f32 %v668_v33, %v1504_v11  ;;  %v1588_v11 = vpop.permute.xlu1 %303 }
 0x120   :  { %v1041_v13 = vpop.eup %1040  ;;  %716 = vmatpush.msrb.mxu2 %v689_v5  ;;  %v663_v15 = vadd.f32 1.0, %v1039_v27  ;;  %v683_v29 = vmul.f32 %v665_v30, %v1509_v25 }
 0x121   :  { %757 = vmatpush.msrb.mxu3 %v690_v6  ;;  %v664_v56 = vadd.f32 1.0, %v1041_v13  ;;  %v684_v17 = vmul.f32 %v666_v23, %v1512_v32 }
 0x122   :  { %717 = vmatpush.msrb.mxu2 %v687_v53  ;;  %v681_v36 = vmul.f32 %v663_v15, %v1515_v26 }
 0x123   :  { %758 = vmatpush.msrb.mxu3 %v688_v4  ;;  %v682_v7 = vmul.f32 %v664_v56, %v1518_v35  ;;  %v1592_v35 = vpop.permute.xlu2 %308 }
 0x124   :  { %718 = vmatpush.msrb.mxu2 %v685_v38 }
 0x125   :  { %759 = vmatpush.msrb.mxu3 %v686_v58 }
 0x126   :  { %719 = vmatpush.msrb.mxu2 %v683_v29 }
 0x127   :  { %760 = vmatpush.msrb.mxu3 %v684_v17  ;;  %v1612_v5 = vpop.permute.xlu1 %318 }
 0x128   :  { %720 = vmatpush.msrb.mxu2 %v681_v36 }
 0x129   :  { %761 = vmatpush.msrb.mxu3 %v682_v7  ;;  %933 = vmatmul.msk.f32.vlgmr.msrb.gmra.mxu2 %vm336_vm3, %v1392_v24 }
 0x12a   :  { %942 = vmatmul.msk.f32.vlgmr.msrb.gmra.mxu3 %vm336_vm3, %v1392_v24  ;;  %v1584_v24 = vpop.permute.xlu0 %298 }
 0x12b   :  { %v1622_v56 = vpop.permute.xlu2 %323 }
 0x131   :  { %934 = vmatmul.msk.f32.gmra.mxu2 %vm336_vm3, %v1402_v34 }
 0x132   :  { %943 = vmatmul.msk.f32.gmra.mxu3 %vm336_vm3, %v1402_v34  ;;  %v1602_v45 = vpop.permute.xlu0 %313 }
 0x139   :  { %935 = vmatmul.msk.f32.gmra.mxu2 %vm336_vm3, %v1411_v46 }
 0x13a   :  { %944 = vmatmul.msk.f32.gmra.mxu3 %vm336_vm3, %v1411_v46 }
 0x141   :  { %936 = vmatmul.msk.f32.gmra.mxu2 %vm336_vm3, %v1420_v50 }
 0x142   :  { %945 = vmatmul.msk.f32.gmra.mxu3 %vm336_vm3, %v1420_v50 }
 0x149   :  { %937 = vmatmul.msk.f32.gmra.mxu2 %vm336_vm3, %v1429_v55 }
 0x14a   :  { %946 = vmatmul.msk.f32.gmra.mxu3 %vm336_vm3, %v1429_v55 }
 0x151   :  { %938 = vmatmul.msk.f32.gmra.mxu2 %vm336_vm3, %v1446_v8 }
 0x152   :  { %947 = vmatmul.msk.f32.gmra.mxu3 %vm336_vm3, %v1446_v8 }
 0x159   :  { %939 = vmatmul.msk.f32.gmra.mxu2 %vm336_vm3, %v1483_v52 }
 0x15a   :  { %948 = vmatmul.msk.f32.gmra.mxu3 %vm336_vm3, %v1483_v52 }
 0x161   :  { %940 = vmatmul.msk.f32.gmra.mxu2 %vm336_vm3, %v1524_v47 }
 0x162   :  { %949 = vmatmul.msk.f32.gmra.mxu3 %vm336_vm3, %v1524_v47 }
 0x164   :  { %v385_v34 = vpop.f32.mrf.mxu2 }
 0x165   :  { %v386_v46 = vadd.f32 %v385_v34, %v1584_v24  ;;  %v426_v50 = vpop.f32.mrf.mxu3 }
 0x166   :  { %v427_v55 = vadd.f32 %v426_v50, %v1584_v24 }
 0x167   :  { %v450_v8 = vmul.f32 0.5, %v386_v46 }
 0x168   :  { %v451_v39 = vmul.f32 0.5, %v427_v55 }
 0x169   :  { %1042 = vtanh.f32 %v450_v8 }
 0x16a   :  { %1044 = vtanh.f32 %v451_v39 }
 0x16c   :  { %v388_v52 = vpop.f32.mrf.mxu2 }
 0x16d   :  { %v389_v59 = vadd.f32 %v388_v52, %v1588_v11  ;;  %v429_v25 = vpop.f32.mrf.mxu3 }
 0x16e   :  { %v430_v40 = vadd.f32 %v429_v25, %v1588_v11  ;;  %v1632_v25 = vpop.permute.xlu0 %328 }
 0x16f   :  { %v1043_v32 = vpop.eup %1042  ;;  %v452_v41 = vmul.f32 0.5, %v389_v59 }
 0x170   :  { %v1045_v21 = vpop.eup %1044  ;;  %v482_v10 = vadd.f32 1.0, %v1043_v32  ;;  %v453_v26 = vmul.f32 0.5, %v430_v40 }
 0x171   :  { %v483_v28 = vadd.f32 1.0, %v1045_v21  ;;  %1046 = vtanh.f32 %v452_v41 }
 0x172   :  { %v498_v31 = vmul.f32 %v482_v10, %v450_v8  ;;  %1048 = vtanh.f32 %v453_v26 }
 0x173   :  { %v499_v42 = vmul.f32 %v483_v28, %v451_v39 }
 0x174   :  { %514 = vst [vmem:[%s1733_s5] sm:$0xff] %v498_v31  ;;  %v391_v37 = vpop.f32.mrf.mxu2 }
 0x175   :  { %515 = vst [vmem:[%s1733_s5 + $0x8] sm:$0xff] %v499_v42  ;;  %v392_v47 = vadd.f32 %v391_v37, %v1592_v35  ;;  %v432_v49 = vpop.f32.mrf.mxu3 }
 0x176   :  { %v433_v51 = vadd.f32 %v432_v49, %v1592_v35 }
 0x177   :  { %v1047_v54 = vpop.eup %1046  ;;  %v454_v61 = vmul.f32 0.5, %v392_v47 }
 0x178   :  { %v1049_v63 = vpop.eup %1048  ;;  %v484_v0 = vadd.f32 1.0, %v1047_v54  ;;  %v455_v1 = vmul.f32 0.5, %v433_v51  ;;  %v1642_v51 = vpop.permute.xlu1 %333 }
 0x179   :  { %v485_v2 = vadd.f32 1.0, %v1049_v63  ;;  %1050 = vtanh.f32 %v454_v61 }
 0x17a   :  { %v500_v3 = vmul.f32 %v484_v0, %v452_v41  ;;  %1052 = vtanh.f32 %v455_v1 }
 0x17b   :  { %v501_v60 = vmul.f32 %v485_v2, %v453_v26 }
 0x17c   :  { %516 = vst [vmem:[%s1733_s5 + $0x10] sm:$0xff] %v500_v3  ;;  %v394_v9 = vpop.f32.mrf.mxu2 }
 0x17d   :  { %517 = vst [vmem:[%s1733_s5 + $0x18] sm:$0xff] %v501_v60  ;;  %v395_v14 = vadd.f32 %v394_v9, %v1602_v45  ;;  %v435_v16 = vpop.f32.mrf.mxu3 }
 0x17e   :  { %v436_v48 = vadd.f32 %v435_v16, %v1602_v45 }
 0x17f   :  { %v1051_v18 = vpop.eup %1050  ;;  %v456_v62 = vmul.f32 0.5, %v395_v14 }
 0x180   :  { %v1053_v12 = vpop.eup %1052  ;;  %v486_v19 = vadd.f32 1.0, %v1051_v18  ;;  %v457_v20 = vmul.f32 0.5, %v436_v48 }
 0x181   :  { %v487_v57 = vadd.f32 1.0, %v1053_v12  ;;  %1054 = vtanh.f32 %v456_v62 }
 0x182   :  { %v502_v22 = vmul.f32 %v486_v19, %v454_v61  ;;  %1056 = vtanh.f32 %v457_v20 }
 0x183   :  { %v503_v43 = vmul.f32 %v487_v57, %v455_v1 }
 0x184   :  { %518 = vst [vmem:[%s1733_s5 + $0x20] sm:$0xff] %v502_v22  ;;  %v397_v44 = vpop.f32.mrf.mxu2 }
 0x185   :  { %519 = vst [vmem:[%s1733_s5 + $0x28] sm:$0xff] %v503_v43  ;;  %v398_v27 = vadd.f32 %v397_v44, %v1612_v5  ;;  %v438_v6 = vpop.f32.mrf.mxu3 }
 0x186   :  { %v439_v33 = vadd.f32 %v438_v6, %v1612_v5 }
 0x187   :  { %v1055_v13 = vpop.eup %1054  ;;  %v458_v53 = vmul.f32 0.5, %v398_v27 }
 0x188   :  { %v1057_v30 = vpop.eup %1056  ;;  %v488_v4 = vadd.f32 1.0, %v1055_v13  ;;  %v459_v23 = vmul.f32 0.5, %v439_v33 }
 0x189   :  { %v489_v38 = vadd.f32 1.0, %v1057_v30  ;;  %1058 = vtanh.f32 %v458_v53 }
 0x18a   :  { %v504_v15 = vmul.f32 %v488_v4, %v456_v62  ;;  %1060 = vtanh.f32 %v459_v23 }
 0x18b   :  { %v505_v58 = vmul.f32 %v489_v38, %v457_v20 }
 0x18c   :  { %520 = vst [vmem:[%s1733_s5 + $0x30] sm:$0xff] %v504_v15  ;;  %v400_v29 = vpop.f32.mrf.mxu2 }
 0x18d   :  { %521 = vst [vmem:[%s1733_s5 + $0x38] sm:$0xff] %v505_v58  ;;  %v401_v17 = vadd.f32 %v400_v29, %v1622_v56  ;;  %v441_v36 = vpop.f32.mrf.mxu3 }
 0x18e   :  { %v442_v7 = vadd.f32 %v441_v36, %v1622_v56 }
 0x18f   :  { %v1059_v34 = vpop.eup %1058  ;;  %v460_v46 = vmul.f32 0.5, %v401_v17 }
 0x190   :  { %v1061_v50 = vpop.eup %1060  ;;  %v490_v55 = vadd.f32 1.0, %v1059_v34  ;;  %v461_v8 = vmul.f32 0.5, %v442_v7 }
 0x191   :  { %v491_v39 = vadd.f32 1.0, %v1061_v50  ;;  %1062 = vtanh.f32 %v460_v46 }
 0x192   :  { %v506_v52 = vmul.f32 %v490_v55, %v458_v53  ;;  %1064 = vtanh.f32 %v461_v8 }
 0x193   :  { %v507_v59 = vmul.f32 %v491_v39, %v459_v23 }
 0x194   :  { %522 = vst [vmem:[%s1733_s5 + $0x40] sm:$0xff] %v506_v52  ;;  %v403_v40 = vpop.f32.mrf.mxu2 }
 0x195   :  { %523 = vst [vmem:[%s1733_s5 + $0x48] sm:$0xff] %v507_v59  ;;  %v404_v32 = vadd.f32 %v403_v40, %v1632_v25  ;;  %v444_v41 = vpop.f32.mrf.mxu3 }
 0x196   :  { %v445_v21 = vadd.f32 %v444_v41, %v1632_v25 }
 0x197   :  { %v1063_v10 = vpop.eup %1062  ;;  %v462_v26 = vmul.f32 0.5, %v404_v32 }
 0x198   :  { %v1065_v28 = vpop.eup %1064  ;;  %v492_v31 = vadd.f32 1.0, %v1063_v10  ;;  %v463_v42 = vmul.f32 0.5, %v445_v21 }
 0x199   :  { %v493_v37 = vadd.f32 1.0, %v1065_v28  ;;  %1066 = vtanh.f32 %v462_v26 }
 0x19a   :  { %v508_v47 = vmul.f32 %v492_v31, %v460_v46  ;;  %1068 = vtanh.f32 %v463_v42 }
 0x19b   :  { %v509_v49 = vmul.f32 %v493_v37, %v461_v8 }
 0x19c   :  { %524 = vst [vmem:[%s1733_s5 + $0x50] sm:$0xff] %v508_v47  ;;  %v406_v54 = vpop.f32.mrf.mxu2 }
 0x19d   :  { %525 = vst [vmem:[%s1733_s5 + $0x58] sm:$0xff] %v509_v49  ;;  %v407_v61 = vadd.f32 %v406_v54, %v1642_v51  ;;  %v447_v63 = vpop.f32.mrf.mxu3 }
 0x19e   :  { %v448_v0 = vadd.f32 %v447_v63, %v1642_v51 }
 0x19f   :  { %v1067_v1 = vpop.eup %1066  ;;  %v464_v2 = vmul.f32 0.5, %v407_v61 }
 0x1a0   :  { %v1069_v3 = vpop.eup %1068  ;;  %v494_v60 = vadd.f32 1.0, %v1067_v1  ;;  %v465_v9 = vmul.f32 0.5, %v448_v0 }
 0x1a1   :  { %v495_v14 = vadd.f32 1.0, %v1069_v3  ;;  %1070 = vtanh.f32 %v464_v2 }
 0x1a2   :  { %v510_v16 = vmul.f32 %v494_v60, %v462_v26  ;;  %1072 = vtanh.f32 %v465_v9 }
 0x1a3   :  { %v511_v48 = vmul.f32 %v495_v14, %v463_v42 }
 0x1a4   :  { %526 = vst [vmem:[%s1733_s5 + $0x60] sm:$0xff] %v510_v16 }
 0x1a5   :  { %527 = vst [vmem:[%s1733_s5 + $0x68] sm:$0xff] %v511_v48 }
 0x1a7   :  { %v1071_v18 = vpop.eup %1070 }
 0x1a8   :  { %v1073_v62 = vpop.eup %1072  ;;  %v496_v12 = vadd.f32 1.0, %v1071_v18 }
 0x1a9   :  { %v497_v19 = vadd.f32 1.0, %v1073_v62 }
 0x1aa   :  { %v512_v20 = vmul.f32 %v496_v12, %v464_v2 }
 0x1ab   :  { %v513_v57 = vmul.f32 %v497_v19, %v465_v9 }
 0x1ac   :  { %528 = vst [vmem:[%s1733_s5 + $0x70] sm:$0x1] %v512_v20  ;;  %v722_v22 = vpop.f32.mrf.mxu2 }
 0x1ad   :  { %529 = vst [vmem:[%s1733_s5 + $0x78] sm:$0x1] %v513_v57  ;;  %v723_v43 = vadd.f32 %v722_v22, %v1584_v24  ;;  %v763_v44 = vpop.f32.mrf.mxu3 }
 0x1ae   :  { %v764_v27 = vadd.f32 %v763_v44, %v1584_v24 }
 0x1af   :  { %v787_v6 = vmul.f32 0.5, %v723_v43 }
 0x1b0   :  { %v788_v33 = vmul.f32 0.5, %v764_v27 }
 0x1b1   :  { %1074 = vtanh.f32 %v787_v6 }
 0x1b2   :  { %1076 = vtanh.f32 %v788_v33 }
 0x1b4   :  { %v725_v13 = vpop.f32.mrf.mxu2 }
 0x1b5   :  { %v726_v53 = vadd.f32 %v725_v13, %v1588_v11  ;;  %v766_v30 = vpop.f32.mrf.mxu3 }
 0x1b6   :  { %v767_v4 = vadd.f32 %v766_v30, %v1588_v11 }
 0x1b7   :  { %v1075_v23 = vpop.eup %1074  ;;  %v789_v38 = vmul.f32 0.5, %v726_v53 }
 0x1b8   :  { %v1077_v15 = vpop.eup %1076  ;;  %v819_v58 = vadd.f32 1.0, %v1075_v23  ;;  %v790_v29 = vmul.f32 0.5, %v767_v4 }
 0x1b9   :  { %v820_v17 = vadd.f32 1.0, %v1077_v15  ;;  %1078 = vtanh.f32 %v789_v38 }
 0x1ba   :  { %v835_v36 = vmul.f32 %v819_v58, %v787_v6  ;;  %1080 = vtanh.f32 %v790_v29 }
 0x1bb   :  { %v836_v24 = vmul.f32 %v820_v17, %v788_v33 }
 0x1bc   :  { %950 = vst [vmem:[%s1733_s5 + $0x80] sm:$0xff] %v835_v36  ;;  %v728_v7 = vpop.f32.mrf.mxu2 }
 0x1bd   :  { %951 = vst [vmem:[%s1733_s5 + $0x88] sm:$0xff] %v836_v24  ;;  %v729_v11 = vadd.f32 %v728_v7, %v1592_v35  ;;  %v769_v34 = vpop.f32.mrf.mxu3 }
 0x1be   :  { %v770_v46 = vadd.f32 %v769_v34, %v1592_v35 }
 0x1bf   :  { %v1079_v50 = vpop.eup %1078  ;;  %v791_v55 = vmul.f32 0.5, %v729_v11 }
 0x1c0   :  { %v1081_v8 = vpop.eup %1080  ;;  %v821_v39 = vadd.f32 1.0, %v1079_v50  ;;  %v792_v52 = vmul.f32 0.5, %v770_v46 }
 0x1c1   :  { %v822_v59 = vadd.f32 1.0, %v1081_v8  ;;  %1082 = vtanh.f32 %v791_v55 }
 0x1c2   :  { %v837_v40 = vmul.f32 %v821_v39, %v789_v38  ;;  %1084 = vtanh.f32 %v792_v52 }
 0x1c3   :  { %v838_v32 = vmul.f32 %v822_v59, %v790_v29 }
 0x1c4   :  { %952 = vst [vmem:[%s1733_s5 + $0x90] sm:$0xff] %v837_v40  ;;  %v731_v41 = vpop.f32.mrf.mxu2 }
 0x1c5   :  { %953 = vst [vmem:[%s1733_s5 + $0x98] sm:$0xff] %v838_v32  ;;  %v732_v35 = vadd.f32 %v731_v41, %v1602_v45  ;;  %v772_v21 = vpop.f32.mrf.mxu3 }
 0x1c6   :  { %v773_v10 = vadd.f32 %v772_v21, %v1602_v45 }
 0x1c7   :  { %v1083_v26 = vpop.eup %1082  ;;  %v793_v28 = vmul.f32 0.5, %v732_v35 }
 0x1c8   :  { %v1085_v31 = vpop.eup %1084  ;;  %v823_v42 = vadd.f32 1.0, %v1083_v26  ;;  %v794_v37 = vmul.f32 0.5, %v773_v10 }
 0x1c9   :  { %v824_v47 = vadd.f32 1.0, %v1085_v31  ;;  %1086 = vtanh.f32 %v793_v28 }
 0x1ca   :  { %v839_v49 = vmul.f32 %v823_v42, %v791_v55  ;;  %1088 = vtanh.f32 %v794_v37 }
 0x1cb   :  { %v840_v54 = vmul.f32 %v824_v47, %v792_v52 }
 0x1cc   :  { %954 = vst [vmem:[%s1733_s5 + $0xa0] sm:$0xff] %v839_v49  ;;  %v734_v61 = vpop.f32.mrf.mxu2 }
 0x1cd   :  { %955 = vst [vmem:[%s1733_s5 + $0xa8] sm:$0xff] %v840_v54  ;;  %v735_v45 = vadd.f32 %v734_v61, %v1612_v5  ;;  %v775_v63 = vpop.f32.mrf.mxu3 }
 0x1ce   :  { %v776_v0 = vadd.f32 %v775_v63, %v1612_v5 }
 0x1cf   :  { %v1087_v1 = vpop.eup %1086  ;;  %v795_v2 = vmul.f32 0.5, %v735_v45 }
 0x1d0   :  { %v1089_v3 = vpop.eup %1088  ;;  %v825_v60 = vadd.f32 1.0, %v1087_v1  ;;  %v796_v9 = vmul.f32 0.5, %v776_v0 }
 0x1d1   :  { %v826_v14 = vadd.f32 1.0, %v1089_v3  ;;  %1090 = vtanh.f32 %v795_v2 }
 0x1d2   :  { %v841_v16 = vmul.f32 %v825_v60, %v793_v28  ;;  %1092 = vtanh.f32 %v796_v9 }
 0x1d3   :  { %v842_v48 = vmul.f32 %v826_v14, %v794_v37 }
 0x1d4   :  { %956 = vst [vmem:[%s1733_s5 + $0xb0] sm:$0xff] %v841_v16  ;;  %v737_v18 = vpop.f32.mrf.mxu2 }
 0x1d5   :  { %957 = vst [vmem:[%s1733_s5 + $0xb8] sm:$0xff] %v842_v48  ;;  %v738_v5 = vadd.f32 %v737_v18, %v1622_v56  ;;  %v778_v62 = vpop.f32.mrf.mxu3 }
 0x1d6   :  { %v779_v12 = vadd.f32 %v778_v62, %v1622_v56 }
 0x1d7   :  { %v1091_v19 = vpop.eup %1090  ;;  %v797_v20 = vmul.f32 0.5, %v738_v5 }
 0x1d8   :  { %v1093_v57 = vpop.eup %1092  ;;  %v827_v22 = vadd.f32 1.0, %v1091_v19  ;;  %v798_v43 = vmul.f32 0.5, %v779_v12 }
 0x1d9   :  { %v828_v44 = vadd.f32 1.0, %v1093_v57  ;;  %1094 = vtanh.f32 %v797_v20 }
 0x1da   :  { %v843_v27 = vmul.f32 %v827_v22, %v795_v2  ;;  %1096 = vtanh.f32 %v798_v43 }
 0x1db   :  { %v844_v6 = vmul.f32 %v828_v44, %v796_v9 }
 0x1dc   :  { %958 = vst [vmem:[%s1733_s5 + $0xc0] sm:$0xff] %v843_v27  ;;  %v740_v33 = vpop.f32.mrf.mxu2 }
 0x1dd   :  { %959 = vst [vmem:[%s1733_s5 + $0xc8] sm:$0xff] %v844_v6  ;;  %v741_v56 = vadd.f32 %v740_v33, %v1632_v25  ;;  %v781_v13 = vpop.f32.mrf.mxu3 }
 0x1de   :  { %v782_v53 = vadd.f32 %v781_v13, %v1632_v25 }
 0x1df   :  { %v1095_v30 = vpop.eup %1094  ;;  %v799_v4 = vmul.f32 0.5, %v741_v56 }
 0x1e0   :  { %v1097_v23 = vpop.eup %1096  ;;  %v829_v38 = vadd.f32 1.0, %v1095_v30  ;;  %v800_v15 = vmul.f32 0.5, %v782_v53 }
 0x1e1   :  { %v830_v58 = vadd.f32 1.0, %v1097_v23  ;;  %1098 = vtanh.f32 %v799_v4 }
 0x1e2   :  { %v845_v29 = vmul.f32 %v829_v38, %v797_v20  ;;  %1100 = vtanh.f32 %v800_v15 }
 0x1e3   :  { %v846_v17 = vmul.f32 %v830_v58, %v798_v43 }
 0x1e4   :  { %960 = vst [vmem:[%s1733_s5 + $0xd0] sm:$0xff] %v845_v29  ;;  %v743_v36 = vpop.f32.mrf.mxu2 }
 0x1e5   :  { %961 = vst [vmem:[%s1733_s5 + $0xd8] sm:$0xff] %v846_v17  ;;  %v744_v25 = vadd.f32 %v743_v36, %v1642_v51  ;;  %v784_v24 = vpop.f32.mrf.mxu3 }
 0x1e6   :  { %v785_v7 = vadd.f32 %v784_v24, %v1642_v51 }
 0x1e7   :  { %v1099_v11 = vpop.eup %1098  ;;  %v801_v34 = vmul.f32 0.5, %v744_v25 }
 0x1e8   :  { %v1101_v46 = vpop.eup %1100  ;;  %v831_v50 = vadd.f32 1.0, %v1099_v11  ;;  %v802_v55 = vmul.f32 0.5, %v785_v7 }
 0x1e9   :  { %v832_v8 = vadd.f32 1.0, %v1101_v46  ;;  %1102 = vtanh.f32 %v801_v34 }
 0x1ea   :  { %v847_v39 = vmul.f32 %v831_v50, %v799_v4  ;;  %1104 = vtanh.f32 %v802_v55 }
 0x1eb   :  { %v848_v52 = vmul.f32 %v832_v8, %v800_v15 }
 0x1ec   :  { %962 = vst [vmem:[%s1733_s5 + $0xe0] sm:$0xff] %v847_v39 }
 0x1ed   :  { %963 = vst [vmem:[%s1733_s5 + $0xe8] sm:$0xff] %v848_v52 }
 0x1ef   :  { %v1103_v59 = vpop.eup %1102 }
 0x1f0   :  { %v1105_v51 = vpop.eup %1104  ;;  %v833_v40 = vadd.f32 1.0, %v1103_v59 }
 0x1f1   :  { %v834_v32 = vadd.f32 1.0, %v1105_v51 }
 0x1f2   :  { %v849_v41 = vmul.f32 %v833_v40, %v801_v34 }
 0x1f3   :  { %v850_v35 = vmul.f32 %v834_v32, %v802_v55 }
 0x1f4   :  { %964 = vst [vmem:[%s1733_s5 + $0xf0] sm:$0x1] %v849_v41 }
 0x1f5   :  { %965 = vst [vmem:[%s1733_s5 + $0xf8] sm:$0x1] %v850_v35 }

</bundles_post_ra>
